<compile_context>
chip_gen: v7x
topology: tpu7x:2x2x1
jax: 0.10.0
libtpu: 0.0.40
codegen_flags: <defaults>
</compile_context>

<pallas_src>
import jax
import jax.numpy as jnp
from jax import lax
from jax.experimental import pallas as pl
from jax.experimental.pallas import tpu as pltpu

LEAKY_SLOPE = 0.2
BN_EPS = 1e-5
LANE = 128
VMEM_BUDGET = 40 * 1024 * 1024   # heuristic block budget (v7x-safe)
VMEM_LIMIT = 48 * 1024 * 1024


def _round_up(x, m):
    return (x + m - 1) // m * m


def _pick_tm(M, Kp, Cp):
    """Largest M tile whose double-buffered blocks fit comfortably in VMEM."""
    tm = 128
    for cand in (1024, 512, 256, 128):
        est = 2 * (cand * Kp * 2) + 2 * (Kp * Cp * 2) + 2 * (cand * Cp * 4)
        if est <= VMEM_BUDGET:
            tm = cand
            break
    return min(tm, _round_up(M, LANE))


def _conv_stats_kernel(p_ref, w_ref, y_ref, sum_ref, sumsq_ref):
    """Pass 1: y0 = patches @ W (bf16 in, f32 acc), store y0, accumulate stats."""
    @pl.when(pl.program_id(0) == 0)
    def _():
        sum_ref[...] = jnp.zeros_like(sum_ref)
        sumsq_ref[...] = jnp.zeros_like(sumsq_ref)

    y0 = jnp.dot(p_ref[...], w_ref[...], preferred_element_type=jnp.float32)
    y_ref[...] = y0
    sum_ref[...] += jnp.sum(y0, axis=0, keepdims=True)
    sumsq_ref[...] += jnp.sum(y0 * y0, axis=0, keepdims=True)


def _bn_apply_kernel(y_ref, scale_ref, shift_ref, o_ref):
    """Pass 2: elementwise BN affine, in-place (y aliased to o)."""
    o_ref[...] = y_ref[...] * scale_ref[...] + shift_ref[...]


def downsample_forward(x, weight, bias, gamma, beta):
    """LeakyReLU(0.2) -> Conv2d(4, stride 2, pad 1) -> BatchNorm2d (batch stats).

    x: (N, C_in, H, W) f32; weight: (C_out, C_in, 4, 4); bias/gamma/beta: (C_out,)
    Returns (N, C_out, H//2, W//2) f32.
    """
    del bias  # conv bias cancels exactly against the batch mean in training-mode BN
    N, Cin, H, W = x.shape
    Cout, _, KH, KW = weight.shape
    stride = 2
    OH = (H + 2 - KH) // stride + 1
    OW = (W + 2 - KW) // stride + 1
    M = N * OH * OW
    K = Cin * KH * KW

    # --- LeakyReLU on x (f32), then im2col directly in (N, OH, OW, K) bf16 ---
    x_act = jnp.where(x >= 0, x, LEAKY_SLOPE * x)
    patches = lax.conv_general_dilated_patches(
        x_act.astype(jnp.bfloat16),
        filter_shape=(KH, KW),
        window_strides=(stride, stride),
        padding=((1, 1), (1, 1)),
        dimension_numbers=("NCHW", "OIHW", "NHWC"),
    ).reshape(M, K)  # feature ordering: c * (KH*KW) + kh*KW + kw

    # --- padded, lane-dense shapes ---
    Kp = _round_up(K, LANE)
    Cp = _round_up(Cout, LANE)
    TM = _pick_tm(M, Kp, Cp)
    Mp = _round_up(M, TM)

    patches = jnp.pad(patches, ((0, Mp - M), (0, Kp - K)))

    # weight (Cout, Cin, KH, KW) -> (K, Cout) matching patch ordering, padded.
    w2d = jnp.transpose(weight, (1, 2, 3, 0)).reshape(K, Cout)
    w2d = jnp.pad(w2d, ((0, Kp - K), (0, Cp - Cout))).astype(jnp.bfloat16)

    gamma_p = jnp.pad(gamma.astype(jnp.float32), (0, Cp - Cout)).reshape(1, Cp)
    beta_p = jnp.pad(beta.astype(jnp.float32), (0, Cp - Cout)).reshape(1, Cp)

    grid = (Mp // TM,)
    p_spec = pl.BlockSpec((TM, Kp), lambda i: (i, 0))
    w_spec = pl.BlockSpec((Kp, Cp), lambda i: (0, 0))
    y_spec = pl.BlockSpec((TM, Cp), lambda i: (i, 0))
    vec_spec = pl.BlockSpec((1, Cp), lambda i: (0, 0))

    # --- pass 1: conv matmul once, write y0, accumulate global BN stats ---
    y2d, s, ss = pl.pallas_call(
        _conv_stats_kernel,
        out_shape=(jax.ShapeDtypeStruct((Mp, Cp), jnp.float32),
                   jax.ShapeDtypeStruct((1, Cp), jnp.float32),
                   jax.ShapeDtypeStruct((1, Cp), jnp.float32)),
        grid=grid,
        in_specs=[p_spec, w_spec],
        out_specs=(y_spec, vec_spec, vec_spec),
        compiler_params=pltpu.CompilerParams(
            dimension_semantics=("arbitrary",),
            vmem_limit_bytes=VMEM_LIMIT),
    )(patches, w2d)

    # --- finalize BN affine params (tiny, plain JAX) ---
    count = jnp.float32(M)                              # padded rows contribute 0
    mean0 = s / count
    var = jnp.maximum(ss / count - mean0 * mean0, 0.0)  # biased variance
    scale = gamma_p * lax.rsqrt(var + BN_EPS)
    shift = beta_p - mean0 * scale

    # --- pass 2: elementwise scale/shift, in place, megacore-parallel ---
    out2d = pl.pallas_call(
        _bn_apply_kernel,
        out_shape=jax.ShapeDtypeStruct((Mp, Cp), jnp.float32),
        grid=grid,
        in_specs=[y_spec, vec_spec, vec_spec],
        out_specs=y_spec,
        input_output_aliases={0: 0},
        compiler_params=pltpu.CompilerParams(
            dimension_semantics=("parallel",),
            vmem_limit_bytes=VMEM_LIMIT),
    )(y2d, scale, shift)

    out = out2d[:M, :Cout].reshape(N, OH, OW, Cout)
    return jnp.transpose(out, (0, 3, 1, 2))  # back to NCHW (PyTorch parity)


def _reference(x, weight, bias, gamma, beta):
    """Pure-JAX f32 reference of the PyTorch module (training-mode BN)."""
    y = jnp.where(x >= 0, x, LEAKY_SLOPE * x)
    y = lax.conv_general_dilated(
        y, weight, (2, 2), ((1, 1), (1, 1)),
        dimension_numbers=("NCHW", "OIHW", "NCHW"),
        precision=lax.Precision.HIGHEST)
    y = y + bias.reshape(1, -1, 1, 1)
    mean = jnp.mean(y, axis=(0, 2, 3), keepdims=True)
    var = jnp.mean((y - mean) ** 2, axis=(0, 2, 3), keepdims=True)
    yhat = (y - mean) * lax.rsqrt(var + BN_EPS)
    return yhat * gamma.reshape(1, -1, 1, 1) + beta.reshape(1, -1, 1, 1)


if __name__ == "__main__":
    key = jax.random.PRNGKey(0)
    k_x, k_w, k_b = jax.random.split(key, 3)

    N, Cin, H, W = 2, 4, 16, 16
    Cout = 8

    x = jax.random.normal(k_x, (N, Cin, H, W), dtype=jnp.float32)
    fan_in = Cin * 4 * 4
    weight = jax.random.normal(k_w, (Cout, Cin, 4, 4), dtype=jnp.float32) / jnp.sqrt(fan_in)
    bias = jax.random.normal(k_b, (Cout,), dtype=jnp.float32) * 0.01
    gamma = jnp.ones((Cout,), jnp.float32)
    beta = jnp.zeros((Cout,), jnp.float32)

    fwd = jax.jit(downsample_forward)
    out = fwd(x, weight, bias, gamma, beta)
    jax.block_until_ready(out)
    assert out.shape == (N, Cout, H // 2, W // 2), out.shape

    ref = _reference(x, weight, bias, gamma, beta)
    max_err = float(jnp.max(jnp.abs(out - ref)))
    # bf16 matmul operands -> loose tolerance; catches any structural error.
    assert max_err < 0.2, f"max abs err vs f32 reference: {max_err}"

    print("KERNEL_OK")
</pallas_src>

<mosaic_0001>
module attributes {stable_mosaic.version = 11 : i64} {
  func.func @_conv_stats_kernel(%arg0: i32, %arg1: memref<128x128xbf16, #tpu.memory_space<vmem>>, %arg2: memref<128x128xbf16, #tpu.memory_space<vmem>>, %arg3: memref<128x128xf32, #tpu.memory_space<vmem>>, %arg4: memref<1x128xf32, #tpu.memory_space<vmem>>, %arg5: memref<1x128xf32, #tpu.memory_space<vmem>>) attributes {dimension_semantics = [#tpu.dimension_semantics<arbitrary>], iteration_bounds = array<i64: 1>, scalar_prefetch = 0 : i64, scratch_operands = 0 : i64, tpu.core_type = #tpu.core_type<tc>, window_params = [{transform_indices = @transform_0, window_bounds = array<i64: 128, 128>}, {pipeline_mode = #tpu.pipeline_mode<synchronous>, transform_indices = @transform_1, window_bounds = array<i64: 128, 128>}, {transform_indices = @transform_2, window_bounds = array<i64: 128, 128>}, {pipeline_mode = #tpu.pipeline_mode<synchronous>, transform_indices = @transform_3, window_bounds = array<i64: 1, 128>}, {pipeline_mode = #tpu.pipeline_mode<synchronous>, transform_indices = @transform_4, window_bounds = array<i64: 1, 128>}]} {
    %c0_i32 = arith.constant 0 : i32
    %0 = arith.cmpi eq, %arg0, %c0_i32 : i32
    %1 = arith.extui %0 : i1 to i32
    %c0_i32_0 = arith.constant 0 : i32
    %2 = arith.cmpi ne, %1, %c0_i32_0 : i32
    scf.if %2 {
      %cst_16 = arith.constant 0.000000e+00 : f32
      %18 = vector.broadcast %cst_16 : f32 to vector<1x128xf32>
      %c0_17 = arith.constant 0 : index
      %c0_18 = arith.constant 0 : index
      %19 = vector.load %arg4[%c0_17, %c0_18] : memref<1x128xf32, #tpu.memory_space<vmem>>, vector<1x128xf32>
      tpu.vector_store %arg4[%c0_17, %c0_18], %18 {strides = array<i32>} : memref<1x128xf32, #tpu.memory_space<vmem>>, vector<1x128xf32>,
      %cst_19 = arith.constant 0.000000e+00 : f32
      %20 = vector.broadcast %cst_19 : f32 to vector<1x128xf32>
      %c0_20 = arith.constant 0 : index
      %c0_21 = arith.constant 0 : index
      %21 = vector.load %arg5[%c0_20, %c0_21] : memref<1x128xf32, #tpu.memory_space<vmem>>, vector<1x128xf32>
      tpu.vector_store %arg5[%c0_20, %c0_21], %20 {strides = array<i32>} : memref<1x128xf32, #tpu.memory_space<vmem>>, vector<1x128xf32>,
    } else {
    }
    %c0 = arith.constant 0 : index
    %c0_1 = arith.constant 0 : index
    %3 = vector.load %arg1[%c0, %c0_1] : memref<128x128xbf16, #tpu.memory_space<vmem>>, vector<128x128xbf16>
    %c0_2 = arith.constant 0 : index
    %c0_3 = arith.constant 0 : index
    %4 = vector.load %arg2[%c0_2, %c0_3] : memref<128x128xbf16, #tpu.memory_space<vmem>>, vector<128x128xbf16>
    %cst = arith.constant dense<0.000000e+00> : vector<128x128xf32>
    %5 = tpu.matmul %3, %4, %cst {dimension_numbers = #tpu.dot_dimension_numbers<[1], [0], [0], [1], [0, 0, 1, 1], [], []>} : vector<128x128xbf16>, vector<128x128xbf16>, vector<128x128xf32> -> vector<128x128xf32>
    %c0_4 = arith.constant 0 : index
    %c0_5 = arith.constant 0 : index
    %6 = vector.load %arg3[%c0_4, %c0_5] : memref<128x128xf32, #tpu.memory_space<vmem>>, vector<128x128xf32>
    tpu.vector_store %arg3[%c0_4, %c0_5], %5 {strides = array<i32>} : memref<128x128xf32, #tpu.memory_space<vmem>>, vector<128x128xf32>,
    %c0_6 = arith.constant 0 : index
    %c0_7 = arith.constant 0 : index
    %7 = vector.load %arg4[%c0_6, %c0_7] : memref<1x128xf32, #tpu.memory_space<vmem>>, vector<1x128xf32>
    %cst_8 = arith.constant dense<0.000000e+00> : vector<128xf32>
    %8 = vector.multi_reduction <add>, %5, %cst_8 [0] : vector<128x128xf32> to vector<128xf32>
    %9 = vector.shape_cast %8 : vector<128xf32> to vector<1x128xf32>
    %10 = arith.addf %7, %9 : vector<1x128xf32>
    %c0_9 = arith.constant 0 : index
    %c0_10 = arith.constant 0 : index
    %11 = vector.load %arg4[%c0_9, %c0_10] : memref<1x128xf32, #tpu.memory_space<vmem>>, vector<1x128xf32>
    tpu.vector_store %arg4[%c0_9, %c0_10], %10 {strides = array<i32>} : memref<1x128xf32, #tpu.memory_space<vmem>>, vector<1x128xf32>,
    %c0_11 = arith.constant 0 : index
    %c0_12 = arith.constant 0 : index
    %12 = vector.load %arg5[%c0_11, %c0_12] : memref<1x128xf32, #tpu.memory_space<vmem>>, vector<1x128xf32>
    %13 = arith.mulf %5, %5 : vector<128x128xf32>
    %cst_13 = arith.constant dense<0.000000e+00> : vector<128xf32>
    %14 = vector.multi_reduction <add>, %13, %cst_13 [0] : vector<128x128xf32> to vector<128xf32>
    %15 = vector.shape_cast %14 : vector<128xf32> to vector<1x128xf32>
    %16 = arith.addf %12, %15 : vector<1x128xf32>
    %c0_14 = arith.constant 0 : index
    %c0_15 = arith.constant 0 : index
    %17 = vector.load %arg5[%c0_14, %c0_15] : memref<1x128xf32, #tpu.memory_space<vmem>>, vector<1x128xf32>
    tpu.vector_store %arg5[%c0_14, %c0_15], %16 {strides = array<i32>} : memref<1x128xf32, #tpu.memory_space<vmem>>, vector<1x128xf32>,
    return
  }
  func.func @transform_0(%arg0: i32) -> (i32, i32) {
    %c0_i32 = arith.constant 0 : i32
    %c0_i32_0 = arith.constant 0 : i32
    return %arg0, %c0_i32 : i32, i32
  }
  func.func @transform_1(%arg0: i32) -> (i32, i32) {
    %c0_i32 = arith.constant 0 : i32
    %c0_i32_0 = arith.constant 0 : i32
    %c0_i32_1 = arith.constant 0 : i32
    return %c0_i32, %c0_i32_0 : i32, i32
  }
  func.func @transform_2(%arg0: i32) -> (i32, i32) {
    %c0_i32 = arith.constant 0 : i32
    %c0_i32_0 = arith.constant 0 : i32
    return %arg0, %c0_i32 : i32, i32
  }
  func.func @transform_3(%arg0: i32) -> (i32, i32) {
    %c0_i32 = arith.constant 0 : i32
    %c0_i32_0 = arith.constant 0 : i32
    %c0_i32_1 = arith.constant 0 : i32
    return %c0_i32, %c0_i32_0 : i32, i32
  }
  func.func @transform_4(%arg0: i32) -> (i32, i32) {
    %c0_i32 = arith.constant 0 : i32
    %c0_i32_0 = arith.constant 0 : i32
    %c0_i32_1 = arith.constant 0 : i32
    return %c0_i32, %c0_i32_0 : i32, i32
  }
}

module attributes {stable_mosaic.version = 11 : i64} {
  func.func @_bn_apply_kernel(%arg0: i32, %arg1: memref<128x128xf32, #tpu.memory_space<vmem>>, %arg2: memref<1x128xf32, #tpu.memory_space<vmem>>, %arg3: memref<1x128xf32, #tpu.memory_space<vmem>>, %arg4: memref<128x128xf32, #tpu.memory_space<vmem>>) attributes {dimension_semantics = [#tpu.dimension_semantics<parallel>], iteration_bounds = array<i64: 1>, scalar_prefetch = 0 : i64, scratch_operands = 0 : i64, tpu.core_type = #tpu.core_type<tc>, window_params = [{transform_indices = @transform_0, window_bounds = array<i64: 128, 128>}, {pipeline_mode = #tpu.pipeline_mode<synchronous>, transform_indices = @transform_1, window_bounds = array<i64: 1, 128>}, {pipeline_mode = #tpu.pipeline_mode<synchronous>, transform_indices = @transform_2, window_bounds = array<i64: 1, 128>}, {transform_indices = @transform_3, window_bounds = array<i64: 128, 128>}]} {
    %c0 = arith.constant 0 : index
    %c0_0 = arith.constant 0 : index
    %0 = vector.load %arg1[%c0, %c0_0] : memref<128x128xf32, #tpu.memory_space<vmem>>, vector<128x128xf32>
    %c0_1 = arith.constant 0 : index
    %c0_2 = arith.constant 0 : index
    %1 = vector.load %arg2[%c0_1, %c0_2] : memref<1x128xf32, #tpu.memory_space<vmem>>, vector<1x128xf32>
    %2 = vector.broadcast %1 : vector<1x128xf32> to vector<128x128xf32>
    %3 = arith.mulf %0, %2 : vector<128x128xf32>
    %c0_3 = arith.constant 0 : index
    %c0_4 = arith.constant 0 : index
    %4 = vector.load %arg3[%c0_3, %c0_4] : memref<1x128xf32, #tpu.memory_space<vmem>>, vector<1x128xf32>
    %5 = vector.broadcast %4 : vector<1x128xf32> to vector<128x128xf32>
    %6 = arith.addf %3, %5 : vector<128x128xf32>
    %c0_5 = arith.constant 0 : index
    %c0_6 = arith.constant 0 : index
    %7 = vector.load %arg4[%c0_5, %c0_6] : memref<128x128xf32, #tpu.memory_space<vmem>>, vector<128x128xf32>
    tpu.vector_store %arg4[%c0_5, %c0_6], %6 {strides = array<i32>} : memref<128x128xf32, #tpu.memory_space<vmem>>, vector<128x128xf32>,
    return
  }
  func.func @transform_0(%arg0: i32) -> (i32, i32) {
    %c0_i32 = arith.constant 0 : i32
    %c0_i32_0 = arith.constant 0 : i32
    return %arg0, %c0_i32 : i32, i32
  }
  func.func @transform_1(%arg0: i32) -> (i32, i32) {
    %c0_i32 = arith.constant 0 : i32
    %c0_i32_0 = arith.constant 0 : i32
    %c0_i32_1 = arith.constant 0 : i32
    return %c0_i32, %c0_i32_0 : i32, i32
  }
  func.func @transform_2(%arg0: i32) -> (i32, i32) {
    %c0_i32 = arith.constant 0 : i32
    %c0_i32_0 = arith.constant 0 : i32
    %c0_i32_1 = arith.constant 0 : i32
    return %c0_i32, %c0_i32_0 : i32, i32
  }
  func.func @transform_3(%arg0: i32) -> (i32, i32) {
    %c0_i32 = arith.constant 0 : i32
    %c0_i32_0 = arith.constant 0 : i32
    return %arg0, %c0_i32 : i32, i32
  }
}

</mosaic_0001>

<bundles_post_ra>
// kernel: downsample_forward.3
= control target key start
LH: loop header
LB: loop body
LE: loop exit
PB: predicated region body
PF: predicated region fallthrough
CT: control target
= control target key end

     0   :  { %s220_s0 = inlined_call_operand.vmem [shape: f32[128,128], index: 0, kind: input, shape index: {}, may-alias: {0,3}]   ;;  %s221_s1 = inlined_call_operand.vmem [shape: f32[1,128], index: 1, kind: input, shape index: {}]   ;;  %s222_s2 = inlined_call_operand.vmem [shape: f32[1,128], index: 2, kind: input, shape index: {}]   ;;  %s223_s3 = inlined_call_operand.vmem [shape: f32[128,128], index: 3, kind: output, shape index: {}, may-alias: {0,3}]  }
   0x1   :  { %v14_v0 = vld [vmem:[%s220_s0] sm:$0xff]  ;;  %v15_v4 = vld [vmem:[%s220_s0 + $0x8] sm:$0xff]  ;;  %v16_v5 = vld [vmem:[%s220_s0 + $0x10] sm:$0xff] }
   0x2   :  { %v96_v1 = vld [vmem:[%s221_s1] ss:$0 sm:$0xff]  ;;  %v17_v6 = vld [vmem:[%s220_s0 + $0x18] sm:$0xff]  ;;  %v19_v11 = vld [vmem:[%s220_s0 + $0x28] sm:$0xff] }
   0x3   :  { %v97_v2 = vld [vmem:[%s222_s2] ss:$0 sm:$0xff]  ;;  %v37_v3 = vmul.f32 %v96_v1, %v14_v0  ;;  %v38_v7 = vmul.f32 %v96_v1, %v15_v4  ;;  %v39_v8 = vmul.f32 %v96_v1, %v16_v5  ;;  %v40_v9 = vmul.f32 %v96_v1, %v17_v6  ;;  %v20_v12 = vld [vmem:[%s220_s0 + $0x30] sm:$0xff]  ;;  %v21_v17 = vld [vmem:[%s220_s0 + $0x38] sm:$0xff] }
   0x4   :  { %v18_v10 = vld [vmem:[%s220_s0 + $0x20] sm:$0xff]  ;;  %v42_v15 = vmul.f32 %v96_v1, %v19_v11  ;;  %v43_v16 = vmul.f32 %v96_v1, %v20_v12  ;;  %v23_v19 = vld [vmem:[%s220_s0 + $0x48] sm:$0xff]  ;;  %v44_v23 = vmul.f32 %v96_v1, %v21_v17  ;;  %v24_v24 = vld [vmem:[%s220_s0 + $0x50] sm:$0xff] }
   0x5   :  { %v60_v13 = vadd.f32 %v97_v2, %v37_v3  ;;  %v41_v14 = vmul.f32 %v96_v1, %v18_v10  ;;  %v22_v18 = vld [vmem:[%s220_s0 + $0x40] sm:$0xff]  ;;  %v61_v20 = vadd.f32 %v97_v2, %v38_v7  ;;  %v62_v21 = vadd.f32 %v97_v2, %v39_v8  ;;  %v25_v25 = vld [vmem:[%s220_s0 + $0x58] sm:$0xff] }
   0x6   :  { %v63_v22 = vadd.f32 %v97_v2, %v40_v9  ;;  %v26_v26 = vld [vmem:[%s220_s0 + $0x60] sm:$0xff]  ;;  %v65_v28 = vadd.f32 %v97_v2, %v42_v15  ;;  %v66_v29 = vadd.f32 %v97_v2, %v43_v16  ;;  %v45_v30 = vmul.f32 %v96_v1, %v22_v18 }
   0x7   :  { %76 = vst [vmem:[%s223_s3] sm:$0xff] %v60_v13  ;;  %v64_v27 = vadd.f32 %v97_v2, %v41_v14  ;;  %v67_v34 = vadd.f32 %v97_v2, %v44_v23  ;;  %v46_v35 = vmul.f32 %v96_v1, %v23_v19  ;;  %v47_v36 = vmul.f32 %v96_v1, %v24_v24 }
   0x8   :  { %v48_v37 = vmul.f32 %v96_v1, %v25_v25  ;;  %v68_v38 = vadd.f32 %v97_v2, %v45_v30  ;;  %v49_v39 = vmul.f32 %v96_v1, %v26_v26 }
   0x9   :  { %v69_v42 = vadd.f32 %v97_v2, %v46_v35  ;;  %v70_v43 = vadd.f32 %v97_v2, %v47_v36 }
   0xa   :  { %v71_v44 = vadd.f32 %v97_v2, %v48_v37  ;;  %v72_v46 = vadd.f32 %v97_v2, %v49_v39 }
   0xe   :  { %v27_v31 = vld [vmem:[%s220_s0 + $0x68] sm:$0xff]  ;;  %v28_v32 = vld [vmem:[%s220_s0 + $0x70] sm:$0xff]  ;;  %v29_v33 = vld [vmem:[%s220_s0 + $0x78] sm:$0xff] }
   0xf   :  { %77 = vst [vmem:[%s223_s3 + $0x8] sm:$0xff] %v61_v20  ;;  %78 = vst [vmem:[%s223_s3 + $0x10] sm:$0xff] %v62_v21  ;;  %v50_v40 = vmul.f32 %v96_v1, %v27_v31  ;;  %v51_v41 = vmul.f32 %v96_v1, %v28_v32  ;;  %v52_v45 = vmul.f32 %v96_v1, %v29_v33 }
  0x10   :  { %79 = vst [vmem:[%s223_s3 + $0x18] sm:$0xff] %v63_v22  ;;  %80 = vst [vmem:[%s223_s3 + $0x20] sm:$0xff] %v64_v27 }
  0x11   :  { %81 = vst [vmem:[%s223_s3 + $0x28] sm:$0xff] %v65_v28  ;;  %82 = vst [vmem:[%s223_s3 + $0x30] sm:$0xff] %v66_v29  ;;  %v73_v47 = vadd.f32 %v97_v2, %v50_v40  ;;  %v74_v48 = vadd.f32 %v97_v2, %v51_v41  ;;  %v75_v49 = vadd.f32 %v97_v2, %v52_v45 }
  0x12   :  { %83 = vst [vmem:[%s223_s3 + $0x38] sm:$0xff] %v67_v34  ;;  %84 = vst [vmem:[%s223_s3 + $0x40] sm:$0xff] %v68_v38 }
  0x13   :  { %85 = vst [vmem:[%s223_s3 + $0x48] sm:$0xff] %v69_v42  ;;  %86 = vst [vmem:[%s223_s3 + $0x50] sm:$0xff] %v70_v43 }
  0x14   :  { %87 = vst [vmem:[%s223_s3 + $0x58] sm:$0xff] %v71_v44  ;;  %88 = vst [vmem:[%s223_s3 + $0x60] sm:$0xff] %v72_v46 }
  0x15   :  { %89 = vst [vmem:[%s223_s3 + $0x68] sm:$0xff] %v73_v47  ;;  %90 = vst [vmem:[%s223_s3 + $0x70] sm:$0xff] %v74_v48 }
  0x16   :  { %91 = vst [vmem:[%s223_s3 + $0x78] sm:$0xff] %v75_v49 }

// kernel: downsample_forward.2
= control target key start
LH: loop header
LB: loop body
LE: loop exit
PB: predicated region body
PF: predicated region fallthrough
CT: control target
= control target key end

     0   :  { %v435_v16 = vmov 0.0   ;;  %s575_s1 = inlined_call_operand.vmem [shape: bf16[128,128], index: 1, kind: input, shape index: {}]   ;;  %s576_s0 = inlined_call_operand.vmem [shape: bf16[128,128], index: 0, kind: input, shape index: {}]   ;;  %s577_s3 = inlined_call_operand.vmem [shape: f32[1,128], index: 3, kind: output, shape index: {1}]   ;;  %s578_s4 = inlined_call_operand.vmem [shape: f32[1,128], index: 4, kind: output, shape index: {2}]   ;;  %s579_s2 = inlined_call_operand.vmem [shape: f32[128,128], index: 2, kind: output, shape index: {0}]  }
   0x1   :  { %v419_v0 = vld [vmem:[%s575_s1] sm:$0xff]   ;;  %v420_v1 = vld [vmem:[%s575_s1 + $0x8] sm:$0xff]   ;;  %v421_v2 = vld [vmem:[%s575_s1 + $0x10] sm:$0xff]   ;;  %19 = vst [vmem:[%s577_s3] sm:$0x1] %v435_v16 }
   0x2   :  { %370 = vmatprep.subr.bf16.mxu0 %v419_v0  ;;  %402 = vmatprep.subr.bf16.mxu1 %v419_v0  ;;  %v422_v3 = vld [vmem:[%s575_s1 + $0x18] sm:$0xff]   ;;  %v427_v4 = vld [vmem:[%s576_s0] sm:$0xff]   ;;  %v424_v7 = vld [vmem:[%s575_s1 + $0x28] sm:$0xff]   ;;  %20 = vst [vmem:[%s578_s4] sm:$0x1] %v435_v16 }
   0x3   :  { %371 = vmatpush3.bf16.msra.mxu0 %v419_v0  ;;  %410 = vmatpush3.bf16.msra.mxu1 %v419_v0  ;;  %v423_v5 = vld [vmem:[%s575_s1 + $0x20] sm:$0xff]   ;;  %v425_v8 = vld [vmem:[%s575_s1 + $0x30] sm:$0xff]   ;;  %v426_v9 = vld [vmem:[%s575_s1 + $0x38] sm:$0xff]  }
   0x4   :  { %372 = vmatprep.subr.bf16.mxu0 %v420_v1  ;;  %403 = vmatprep.subr.bf16.mxu1 %v420_v1  ;;  %v431_v6 = vld [vmem:[%s576_s0 + $0x20] sm:$0xff]   ;;  %v428_v10 = vld [vmem:[%s576_s0 + $0x8] sm:$0xff]   ;;  %v429_v12 = vld [vmem:[%s576_s0 + $0x10] sm:$0xff]  }
   0x5   :  { %386 = vmatprep.mubr.bf16.mxu0 %v427_v4  ;;  %394 = vmatprep.mubr.bf16.mxu1 %v431_v6  ;;  %v432_v11 = vld [vmem:[%s576_s0 + $0x28] sm:$0xff]   ;;  %v433_v13 = vld [vmem:[%s576_s0 + $0x30] sm:$0xff]   ;;  %v430_v14 = vld [vmem:[%s576_s0 + $0x18] sm:$0xff]  }
   0x6   :  { %v434_v15 = vld [vmem:[%s576_s0 + $0x38] sm:$0xff]  }
   0x7   :  { %373 = vmatpush3.bf16.msra.mxu0 %v420_v1  ;;  %411 = vmatpush3.bf16.msra.mxu1 %v420_v1 }
   0x8   :  { %374 = vmatprep.subr.bf16.mxu0 %v421_v2  ;;  %404 = vmatprep.subr.bf16.mxu1 %v421_v2 }
   0xb   :  { %375 = vmatpush3.bf16.msra.mxu0 %v421_v2  ;;  %412 = vmatpush3.bf16.msra.mxu1 %v421_v2 }
   0xc   :  { %376 = vmatprep.subr.bf16.mxu0 %v422_v3  ;;  %405 = vmatprep.subr.bf16.mxu1 %v422_v3 }
   0xf   :  { %377 = vmatpush3.bf16.msra.mxu0 %v422_v3  ;;  %413 = vmatpush3.bf16.msra.mxu1 %v422_v3 }
  0x10   :  { %378 = vmatprep.subr.bf16.mxu0 %v423_v5  ;;  %406 = vmatprep.subr.bf16.mxu1 %v423_v5 }
  0x13   :  { %379 = vmatpush3.bf16.msra.mxu0 %v423_v5  ;;  %414 = vmatpush3.bf16.msra.mxu1 %v423_v5 }
  0x14   :  { %380 = vmatprep.subr.bf16.mxu0 %v424_v7  ;;  %407 = vmatprep.subr.bf16.mxu1 %v424_v7 }
  0x17   :  { %381 = vmatpush3.bf16.msra.mxu0 %v424_v7  ;;  %415 = vmatpush3.bf16.msra.mxu1 %v424_v7 }
  0x18   :  { %382 = vmatprep.subr.bf16.mxu0 %v425_v8  ;;  %408 = vmatprep.subr.bf16.mxu1 %v425_v8 }
  0x1b   :  { %383 = vmatpush3.bf16.msra.mxu0 %v425_v8  ;;  %416 = vmatpush3.bf16.msra.mxu1 %v425_v8 }
  0x1c   :  { %384 = vmatprep.subr.bf16.mxu0 %v426_v9  ;;  %409 = vmatprep.subr.bf16.mxu1 %v426_v9 }
  0x1f   :  { %385 = vmatpush3.bf16.msra.mxu0 %v426_v9  ;;  %417 = vmatpush3.bf16.msra.mxu1 %v426_v9 }
  0x22   :  { %387 = vmatmul.mubr.bf16.vlgmr.msra.gmra.mrb[0].mxu0 %v428_v10  ;;  %395 = vmatmul.mubr.bf16.vlgmr.msra.gmra.mrb[0].mxu1 %v432_v11 }
  0x23   :  { %390 = vmatprep.mubr.bf16.mxu0 %v429_v12  ;;  %398 = vmatprep.mubr.bf16.mxu1 %v433_v13 }
  0x2a   :  { %391 = vmatmul.mubr.bf16.gmra.mrb[4].mxu0 %v430_v14  ;;  %399 = vmatmul.mubr.bf16.gmra.mrb[4].mxu1 %v434_v15 }
  0xf5   :  { %v388_v17 = vpop.f32.mrb[0].mxu0  ;;  %v396_v18 = vpop.f32.mrb[0].mxu1 }
  0xf6   :  { %248 = vst [vmem:[%s579_s2 + $0x10] sm:$0xff] %v388_v17  ;;  %v183_v19 = vpop.f32.mrb[1].mxu0  ;;  %256 = vst [vmem:[%s579_s2 + $0x50] sm:$0xff] %v396_v18  ;;  %v215_v20 = vpop.f32.mrb[1].mxu1  ;;  %v289_v28 = vmul.f32 %v388_v17, %v388_v17  ;;  %v297_v60 = vmul.f32 %v396_v18, %v396_v18 }
  0xf7   :  { %246 = vst [vmem:[%s579_s2] sm:$0xff] %v183_v19  ;;  %v389_v21 = vpop.f32.mrb[2].mxu0  ;;  %254 = vst [vmem:[%s579_s2 + $0x40] sm:$0xff] %v215_v20  ;;  %v397_v22 = vpop.f32.mrb[2].mxu1  ;;  %v287_v25 = vmul.f32 %v183_v19, %v183_v19  ;;  %v295_v54 = vmul.f32 %v215_v20, %v215_v20 }
  0xf8   :  { %249 = vst [vmem:[%s579_s2 + $0x18] sm:$0xff] %v389_v21  ;;  %v186_v23 = vpop.f32.mrb[3].mxu0  ;;  %257 = vst [vmem:[%s579_s2 + $0x58] sm:$0xff] %v397_v22  ;;  %v218_v24 = vpop.f32.mrb[3].mxu1  ;;  %v290_v31 = vmul.f32 %v389_v21, %v389_v21  ;;  %v298_v63 = vmul.f32 %v397_v22, %v397_v22 }
  0xf9   :  { %247 = vst [vmem:[%s579_s2 + $0x8] sm:$0xff] %v186_v23  ;;  %v263_v26 = vadd.f32 %v186_v23, %v183_v19  ;;  %v288_v27 = vmul.f32 %v186_v23, %v186_v23  ;;  %255 = vst [vmem:[%s579_s2 + $0x48] sm:$0xff] %v218_v24  ;;  %v296_v59 = vmul.f32 %v218_v24, %v218_v24 }
  0xfb   :  { %v264_v29 = vadd.f32 %v388_v17, %v263_v26  ;;  %v303_v30 = vadd.f32 %v288_v27, %v287_v25  ;;  %v286_v27 = vld [vmem:[%s578_s4] sm:$0x1] }
  0xfd   :  { %v304_v32 = vadd.f32 %v303_v30, %v289_v28  ;;  %v392_v33 = vpop.f32.mrb[4].mxu0  ;;  %v265_v34 = vadd.f32 %v389_v21, %v264_v29  ;;  %v400_v35 = vpop.f32.mrb[4].mxu1 }
  0xfe   :  { %252 = vst [vmem:[%s579_s2 + $0x30] sm:$0xff] %v392_v33  ;;  %v199_v36 = vpop.f32.mrb[5].mxu0  ;;  %260 = vst [vmem:[%s579_s2 + $0x70] sm:$0xff] %v400_v35  ;;  %v231_v37 = vpop.f32.mrb[5].mxu1  ;;  %v293_v48 = vmul.f32 %v392_v33, %v392_v33  ;;  %v301_v8 = vmul.f32 %v400_v35, %v400_v35 }
  0xff   :  { %250 = vst [vmem:[%s579_s2 + $0x20] sm:$0xff] %v199_v36  ;;  %v266_v38 = vadd.f32 %v265_v34, %v199_v36  ;;  %v291_v39 = vmul.f32 %v199_v36, %v199_v36  ;;  %v305_v40 = vadd.f32 %v304_v32, %v290_v31  ;;  %v393_v41 = vpop.f32.mrb[6].mxu0  ;;  %258 = vst [vmem:[%s579_s2 + $0x60] sm:$0xff] %v231_v37  ;;  %v401_v42 = vpop.f32.mrb[6].mxu1 }
 0x100   :  { %253 = vst [vmem:[%s579_s2 + $0x38] sm:$0xff] %v393_v41  ;;  %v202_v43 = vpop.f32.mrb[7].mxu0  ;;  %261 = vst [vmem:[%s579_s2 + $0x78] sm:$0xff] %v401_v42  ;;  %v234_v44 = vpop.f32.mrb[7].mxu1  ;;  %v294_v51 = vmul.f32 %v393_v41, %v393_v41  ;;  %v299_v2 = vmul.f32 %v231_v37, %v231_v37  ;;  %v302_v11 = vmul.f32 %v401_v42, %v401_v42 }
 0x101   :  { %v306_v45 = vadd.f32 %v305_v40, %v291_v39  ;;  %251 = vst [vmem:[%s579_s2 + $0x28] sm:$0xff] %v202_v43  ;;  %v267_v46 = vadd.f32 %v266_v38, %v202_v43  ;;  %v292_v47 = vmul.f32 %v202_v43, %v202_v43  ;;  %259 = vst [vmem:[%s579_s2 + $0x68] sm:$0xff] %v234_v44 }
 0x102   :  { %v300_v7 = vmul.f32 %v234_v44, %v234_v44 }
 0x103   :  { %v268_v49 = vadd.f32 %v392_v33, %v267_v46  ;;  %v307_v50 = vadd.f32 %v306_v45, %v292_v47 }
 0x105   :  { %v308_v52 = vadd.f32 %v307_v50, %v293_v48  ;;  %v269_v53 = vadd.f32 %v393_v41, %v268_v49 }
 0x107   :  { %v270_v55 = vadd.f32 %v269_v53, %v215_v20  ;;  %v309_v56 = vadd.f32 %v308_v52, %v294_v51 }
 0x109   :  { %v310_v57 = vadd.f32 %v309_v56, %v295_v54  ;;  %v271_v58 = vadd.f32 %v270_v55, %v218_v24  ;;  %v262_v24 = vld [vmem:[%s577_s3] sm:$0x1] }
 0x10b   :  { %v272_v61 = vadd.f32 %v396_v18, %v271_v58  ;;  %v311_v62 = vadd.f32 %v310_v57, %v296_v59 }
 0x10d   :  { %v312_v0 = vadd.f32 %v311_v62, %v297_v60  ;;  %v273_v1 = vadd.f32 %v397_v22, %v272_v61 }
 0x10f   :  { %v274_v3 = vadd.f32 %v273_v1, %v231_v37  ;;  %v313_v4 = vadd.f32 %v312_v0, %v298_v63 }
 0x111   :  { %v314_v5 = vadd.f32 %v313_v4, %v299_v2  ;;  %v275_v6 = vadd.f32 %v274_v3, %v234_v44 }
 0x113   :  { %v276_v9 = vadd.f32 %v400_v35, %v275_v6  ;;  %v315_v10 = vadd.f32 %v314_v5, %v300_v7 }
 0x115   :  { %v277_v12 = vadd.f32 %v401_v42, %v276_v9  ;;  %v316_v13 = vadd.f32 %v315_v10, %v301_v8 }
 0x117   :  { %v278_v14 = vrot.slane %v277_v12, 4  ;;  %v317_v15 = vadd.f32 %v316_v13, %v302_v11 }
 0x119   :  { %v279_v16 = vadd.f32 %v278_v14, %v277_v12  ;;  %v318_v17 = vrot.slane %v317_v15, 4 }
 0x11b   :  { %v280_v18 = vrot.slane %v279_v16, 2  ;;  %v319_v19 = vadd.f32 %v318_v17, %v317_v15 }
 0x11d   :  { %v281_v20 = vadd.f32 %v280_v18, %v279_v16  ;;  %v320_v21 = vrot.slane %v319_v19, 2 }
 0x11f   :  { %v282_v22 = vrot.slane %v281_v20, 1  ;;  %v321_v23 = vadd.f32 %v320_v21, %v319_v19 }
 0x121   :  { %v283_v25 = vadd.f32 %v282_v22, %v281_v20  ;;  %v322_v26 = vrot.slane %v321_v23, 1 }
 0x123   :  { %v284_v28 = vadd.f32 %v283_v25, %v262_v24  ;;  %v323_v29 = vadd.f32 %v322_v26, %v321_v23 }
 0x125   :  { %285 = vst [vmem:[%s577_s3] sm:$0x1] %v284_v28  ;;  %v324_v30 = vadd.f32 %v323_v29, %v286_v27 }
 0x127   :  { %325 = vst [vmem:[%s578_s4] sm:$0x1] %v324_v30 }

</bundles_post_ra>
